<compile_context>
chip_gen: v5e
topology: v5e:2x2
jax: 0.10.0
libtpu: 0.0.40
codegen_flags: <defaults>
</compile_context>

<pallas_src>
import functools

import jax
import jax.numpy as jnp
from jax import lax
from jax.experimental import pallas as pl
from jax.experimental.pallas import tpu as pltpu

EPS = 1e-5
LANES = 128                 # pad the tiny num_classes output to a lane-dense width
MXU_DTYPE = jnp.float32     # set to jnp.bfloat16 on v6e/v7x (f32 accumulation kept)


def _left_tap(od, lo):
    """Left conv tap x[2t-1] for every output row of the flat batch-major slab.

    od: (R, C) odd-position rows (row r = b*lo + t holds x[b, 2t+1]).
    Returns od shifted down one row with a zero row at every batch's t=0 (the
    conv's zero padding).  One batch-wide shift + one select -- O(1) in batch.
    NOTE: pltpu.roll(od, shift=1, axis=0) would put the shift on the XLU slot;
    the slice+concat form below is equivalent at these sizes and keeps the
    semantics target-portable.
    """
    r, c = od.shape
    shifted = jnp.concatenate([od[r - 1:, :], od[:r - 1, :]], axis=0)  # == roll(+1)
    row = lax.broadcasted_iota(jnp.int32, (r, c), 0)
    return jnp.where(row % lo == 0, 0.0, shifted)


def _conv_bn_relu(left, center, right, w_flat, gamma, beta):
    """Conv1d(k=3, pad=1, stride=2) on pre-built taps + BatchNorm(batch stats) + ReLU.

    left/center/right: (R, Cin) taps, R = batch * l_out, flat batch-major rows.
    w_flat: (3*Cin, Cout), row blocks ordered [tap k=0 | k=1 | k=2].
    gamma, beta: (1, Cout) f32.  Returns (R, Cout) f32.
    """
    slab = jnp.concatenate([left, center, right], axis=-1)              # (R, 3*Cin)
    y = jnp.dot(slab.astype(MXU_DTYPE), w_flat.astype(MXU_DTYPE),
                preferred_element_type=jnp.float32)                     # one MXU call
    # Training-mode BatchNorm1d (biased variance over batch*length) folded into
    # one scale/shift; rsqrt on the EUP; all VPU math in f32 (v5e-safe).
    mean = jnp.mean(y, axis=0, keepdims=True)
    var = jnp.mean(jnp.square(y - mean), axis=0, keepdims=True)
    scale = gamma * lax.rsqrt(var + EPS)
    shift = beta - mean * scale
    return jnp.maximum(y * scale + shift, 0.0)


def cnn_kernel(batch, length, tok_even_ref, tok_odd_ref, emb_ref, wc1_ref,
               wc23_ref, bnp_ref, wlb_ref, out_ref, s2, s3):
    vocab = emb_ref.shape[0]
    hidden = wc1_ref.shape[-1]
    l1, l2, l3 = length // 2, length // 4, length // 8
    r1, r2, r3 = batch * l1, batch * l2, batch * l3

    bnp = bnp_ref[...]            # (6, H): rows = g1, be1, g2, be2, g3, be3
    wc23 = wc23_ref[...]          # (2, 3H, H)

    # --- Embedding, fused: one-hot compare (VPU) + matmul (MXU).  Tokens arrive
    # pre-split into even / odd sequence positions in flat batch-major rows, so
    # the layer-1 conv taps come straight out of the two matmuls -- no (B*L, E)
    # scratch, no strided reload, no per-batch copy loop.
    iota_v = lax.broadcasted_iota(jnp.int32, (r1, vocab), 1)
    emb = emb_ref[...].astype(MXU_DTYPE)
    oh_even = (tok_even_ref[...] == iota_v).astype(MXU_DTYPE)            # (B*l1, V)
    oh_odd = (tok_odd_ref[...] == iota_v).astype(MXU_DTYPE)
    ev = jnp.dot(oh_even, emb, preferred_element_type=jnp.float32)       # x[b, 2t]
    od = jnp.dot(oh_odd, emb, preferred_element_type=jnp.float32)        # x[b, 2t+1]

    # --- Layer 1 (E -> H): taps already materialized.
    h = _conv_bn_relu(_left_tap(od, l1), ev, od, wc1_ref[...], bnp[0:1], bnp[1:2])
    s2[...] = h                                                          # (B*l1, H)

    # --- Layer 2 (H -> H): one full store above + two batch-wide stride-2 reads.
    ev = s2[pl.ds(0, r2, stride=2), :]
    od = s2[pl.ds(1, r2, stride=2), :]
    h = _conv_bn_relu(_left_tap(od, l2), ev, od, wc23[0], bnp[2:3], bnp[3:4])
    s3[...] = h                                                          # (B*l2, H)

    # --- Layer 3 (H -> H).
    ev = s3[pl.ds(0, r3, stride=2), :]
    od = s3[pl.ds(1, r3, stride=2), :]
    h = _conv_bn_relu(_left_tap(od, l3), ev, od, wc23[1], bnp[4:5], bnp[5:6])

    # --- AdaptiveMaxPool1d(1) + Flatten: stash the (B*l3, H) slab in the now
    # dead layer-3 scratch and reduce with l3 stride-l3 reads (O(L/8), not O(B)).
    s3[pl.ds(0, r3), :] = h
    pooled = s3[pl.ds(0, batch, stride=l3), :]          # row t=0 of every batch
    for t in range(1, l3):
        pooled = jnp.maximum(pooled, s3[pl.ds(t, batch, stride=l3), :])

    # --- Linear, padded to 128 lanes for an unmasked, lane-dense output store.
    wlb = wlb_ref[...]                                                   # (H+1, 128)
    out_ref[...] = (jnp.dot(pooled.astype(MXU_DTYPE), wlb[:hidden, :].astype(MXU_DTYPE),
                            preferred_element_type=jnp.float32)
                    + wlb[hidden:, :])


def pack_params(p):
    """Host-side (one-time) packing of the 13 small tensors into 5 dense arrays."""
    embed = p['emb'].shape[1]
    hidden = p['w1'].shape[-1]
    num_classes = p['wl'].shape[-1]
    wc1 = p['w1'].reshape(3 * embed, hidden)                             # (3E, H)
    wc23 = jnp.stack([p['w2'].reshape(3 * hidden, hidden),
                      p['w3'].reshape(3 * hidden, hidden)], axis=0)      # (2, 3H, H)
    bnp = jnp.concatenate([p['g1'], p['be1'], p['g2'], p['be2'],
                           p['g3'], p['be3']], axis=0)                   # (6, H)
    wl_pad = jnp.zeros((hidden, LANES), jnp.float32).at[:, :num_classes].set(p['wl'])
    bl_pad = jnp.zeros((1, LANES), jnp.float32).at[:, :num_classes].set(p['bl'])
    wlb = jnp.concatenate([wl_pad, bl_pad], axis=0)                      # (H+1, 128)
    return {'emb': p['emb'], 'wc1': wc1, 'wc23': wc23, 'bnp': bnp, 'wlb': wlb}


def cnn_forward(tokens, q, num_classes):
    batch, length = tokens.shape
    _, embed = q['emb'].shape
    hidden = q['wc1'].shape[-1]
    # TODO(synk): generalize to odd lengths (PyTorch Lout = (L-1)//2 + 1).
    assert length % 8 == 0 and length >= 8, "kernel assumes L is a multiple of 8"

    # Layout plumbing only (tiny int32 arrays): row b*(L/2)+t of tok_even/tok_odd
    # holds token x[b, 2t] / x[b, 2t+1] -- exactly the flat batch-major rows the
    # layer-1 conv taps need, so no activation scratch is required for layer 1.
    tok = tokens.astype(jnp.int32)
    tok_even = tok[:, 0::2].reshape(batch * length // 2, 1)
    tok_odd = tok[:, 1::2].reshape(batch * length // 2, 1)

    vmem = lambda: pl.BlockSpec(memory_space=pltpu.MemorySpace.VMEM)
    args = (tok_even, tok_odd, q['emb'], q['wc1'], q['wc23'], q['bnp'], q['wlb'])
    out = pl.pallas_call(
        functools.partial(cnn_kernel, batch, length),
        out_shape=jax.ShapeDtypeStruct((batch, LANES), jnp.float32),
        in_specs=[vmem() for _ in args],
        out_specs=vmem(),
        scratch_shapes=[
            pltpu.VMEM((batch * length // 2, hidden), jnp.float32),  # layer-2 input
            pltpu.VMEM((batch * length // 4, hidden), jnp.float32),  # layer-3 input / pool stash
        ],
    )(*args)
    return out[:, :num_classes]


def ref_forward(tokens, p):
    """Pure-JAX reference mirroring the PyTorch forward (keeps the conv bias)."""
    h = jnp.take(p['emb'], tokens, axis=0).astype(jnp.float32)
    for i in (1, 2, 3):
        w, b, g, be = p[f'w{i}'], p[f'b{i}'], p[f'g{i}'], p[f'be{i}']
        B, L, C = h.shape
        Lo = (L - 1) // 2 + 1
        hp = jnp.pad(h, ((0, 0), (1, 1), (0, 0)))
        y = sum(jnp.einsum('blc,ch->blh', hp[:, k:k + 2 * Lo:2, :], w[k])
                for k in range(3)) + b
        mean = y.mean((0, 1), keepdims=True)
        var = ((y - mean) ** 2).mean((0, 1), keepdims=True)
        y = (y - mean) / jnp.sqrt(var + EPS) * g + be
        h = jnp.maximum(y, 0.0)
    pooled = h.max(axis=1)
    return pooled @ p['wl'] + p['bl']


def make_params(key, vocab, embed, hidden, num_classes):
    ks = jax.random.split(key, 12)
    f32 = jnp.float32
    p = {}
    p['emb'] = jax.random.normal(ks[0], (vocab, embed), f32) * 0.5
    cins = [embed, hidden, hidden]
    for i in (1, 2, 3):
        cin = cins[i - 1]
        p[f'w{i}'] = jax.random.normal(ks[2 * i - 1], (3, cin, hidden), f32) \
                     * (1.0 / (3 * cin)) ** 0.5
        p[f'b{i}'] = jax.random.normal(ks[2 * i], (1, hidden), f32) * 0.05
        p[f'g{i}'] = 1.0 + 0.1 * jax.random.normal(ks[6 + i], (1, hidden), f32)
        p[f'be{i}'] = 0.1 * jax.random.normal(ks[9], (1, hidden), f32)
    p['wl'] = jax.random.normal(ks[10], (hidden, num_classes), f32) \
              * (1.0 / hidden) ** 0.5
    p['bl'] = jax.random.normal(ks[11], (1, num_classes), f32) * 0.05
    return p


if __name__ == "__main__":
    # Small shapes consistent with the module: vocab=20, embed=8, hidden=32,
    # batch=2, sequence length=16, num_classes=4.
    VOCAB, EMBED, HIDDEN, NUM_CLASSES = 20, 8, 32, 4
    B, L = 2, 16

    key = jax.random.PRNGKey(0)
    pkey, tkey = jax.random.split(key)
    params = make_params(pkey, VOCAB, EMBED, HIDDEN, NUM_CLASSES)
    tokens = jax.random.randint(tkey, (B, L), 0, VOCAB, dtype=jnp.int32)

    packed = pack_params(params)
    out = jax.block_until_ready(cnn_forward(tokens, packed, NUM_CLASSES))
    ref = jax.block_until_ready(ref_forward(tokens, params))

    assert out.shape == (B, NUM_CLASSES)
    assert jnp.allclose(out, ref, atol=1e-3, rtol=1e-3), (out, ref)
    print("KERNEL_OK")
</pallas_src>

<mosaic_0001>
module attributes {stable_mosaic.version = 11 : i64} {
  func.func @cnn_kernel(%arg0: memref<16x1xi32, #tpu.memory_space<vmem>>, %arg1: memref<16x1xi32, #tpu.memory_space<vmem>>, %arg2: memref<20x8xf32, #tpu.memory_space<vmem>>, %arg3: memref<24x32xf32, #tpu.memory_space<vmem>>, %arg4: memref<2x96x32xf32, #tpu.memory_space<vmem>>, %arg5: memref<6x32xf32, #tpu.memory_space<vmem>>, %arg6: memref<33x128xf32, #tpu.memory_space<vmem>>, %arg7: memref<2x128xf32, #tpu.memory_space<vmem>>, %arg8: memref<16x32xf32, #tpu.memory_space<vmem>>, %arg9: memref<8x32xf32, #tpu.memory_space<vmem>>) attributes {dimension_semantics = [], scalar_prefetch = 0 : i64, scratch_operands = 2 : i64, tpu.core_type = #tpu.core_type<tc>} {
    %c0 = arith.constant 0 : index
    %c0_0 = arith.constant 0 : index
    %0 = vector.load %arg5[%c0, %c0_0] : memref<6x32xf32, #tpu.memory_space<vmem>>, vector<6x32xf32>
    %c0_1 = arith.constant 0 : index
    %c0_2 = arith.constant 0 : index
    %c0_3 = arith.constant 0 : index
    %1 = vector.load %arg4[%c0_1, %c0_2, %c0_3] : memref<2x96x32xf32, #tpu.memory_space<vmem>>, vector<2x96x32xf32>
    %2 = tpu.iota {dimensions = array<i32: 1>} : vector<16x20xi32>
    %c0_4 = arith.constant 0 : index
    %c0_5 = arith.constant 0 : index
    %3 = vector.load %arg2[%c0_4, %c0_5] : memref<20x8xf32, #tpu.memory_space<vmem>>, vector<20x8xf32>
    %c0_6 = arith.constant 0 : index
    %c0_7 = arith.constant 0 : index
    %4 = vector.load %arg0[%c0_6, %c0_7] : memref<16x1xi32, #tpu.memory_space<vmem>>, vector<16x1xi32>
    %5 = vector.broadcast %4 : vector<16x1xi32> to vector<16x20xi32>
    %6 = arith.cmpi eq, %5, %2 : vector<16x20xi32>
    %7 = arith.extui %6 : vector<16x20xi1> to vector<16x20xi32>
    %8 = arith.sitofp %7 : vector<16x20xi32> to vector<16x20xf32>
    %c0_8 = arith.constant 0 : index
    %c0_9 = arith.constant 0 : index
    %9 = vector.load %arg1[%c0_8, %c0_9] : memref<16x1xi32, #tpu.memory_space<vmem>>, vector<16x1xi32>
    %10 = vector.broadcast %9 : vector<16x1xi32> to vector<16x20xi32>
    %11 = arith.cmpi eq, %10, %2 : vector<16x20xi32>
    %12 = arith.extui %11 : vector<16x20xi1> to vector<16x20xi32>
    %13 = arith.sitofp %12 : vector<16x20xi32> to vector<16x20xf32>
    %cst = arith.constant dense<0.000000e+00> : vector<16x8xf32>
    %14 = tpu.matmul %8, %3, %cst {dimension_numbers = #tpu.dot_dimension_numbers<[1], [0], [0], [1], [0, 0, 1, 1], [], []>} : vector<16x20xf32>, vector<20x8xf32>, vector<16x8xf32> -> vector<16x8xf32>
    %cst_10 = arith.constant dense<0.000000e+00> : vector<16x8xf32>
    %15 = tpu.matmul %13, %3, %cst_10 {dimension_numbers = #tpu.dot_dimension_numbers<[1], [0], [0], [1], [0, 0, 1, 1], [], []>} : vector<16x20xf32>, vector<20x8xf32>, vector<16x8xf32> -> vector<16x8xf32>
    %16 = vector.extract_strided_slice %15 {offsets = [15, 0], sizes = [1, 8], strides = [1, 1]} : vector<16x8xf32> to vector<1x8xf32>
    %17 = vector.extract_strided_slice %15 {offsets = [0, 0], sizes = [15, 8], strides = [1, 1]} : vector<16x8xf32> to vector<15x8xf32>
    %18 = tpu.concatenate %16, %17 in 0 : vector<1x8xf32>, vector<15x8xf32> -> vector<16x8xf32>
    %19 = tpu.iota {dimensions = array<i32: 0>} : vector<16x8xi32>
    %c8_i32 = arith.constant 8 : i32
    %c0_i32 = arith.constant 0 : i32
    %20 = arith.cmpi eq, %c8_i32, %c0_i32 : i32
    %c1_i32 = arith.constant 1 : i32
    %21 = arith.select %20, %c1_i32, %c8_i32 : i32
    %22 = vector.broadcast %21 : i32 to vector<16x8xi32>
    %23 = arith.remsi %19, %22 : vector<16x8xi32>
    %c0_i32_11 = arith.constant 0 : i32
    %24 = vector.broadcast %c0_i32_11 : i32 to vector<16x8xi32>
    %25 = arith.cmpi ne, %23, %24 : vector<16x8xi32>
    %c0_i32_12 = arith.constant 0 : i32
    %26 = vector.broadcast %c0_i32_12 : i32 to vector<16x8xi32>
    %27 = arith.cmpi slt, %23, %26 : vector<16x8xi32>
    %c0_i32_13 = arith.constant 0 : i32
    %28 = arith.cmpi slt, %21, %c0_i32_13 : i32
    %29 = vector.broadcast %28 : i1 to vector<16x8xi1>
    %30 = vector.broadcast %29 : vector<16x8xi1> to vector<16x8xi1>
    %31 = arith.xori %27, %30 : vector<16x8xi1>
    %32 = arith.andi %31, %25 : vector<16x8xi1>
    %33 = vector.broadcast %21 : i32 to vector<16x8xi32>
    %34 = arith.addi %23, %33 : vector<16x8xi32>
    %35 = arith.select %32, %34, %23 : vector<16x8xi1>, vector<16x8xi32>
    %c0_i32_14 = arith.constant 0 : i32
    %36 = vector.broadcast %c0_i32_14 : i32 to vector<16x8xi32>
    %37 = arith.cmpi eq, %35, %36 : vector<16x8xi32>
    %cst_15 = arith.constant 0.000000e+00 : f32
    %38 = vector.broadcast %cst_15 : f32 to vector<16x8xf32>
    %39 = arith.select %37, %38, %18 : vector<16x8xi1>, vector<16x8xf32>
    %c0_16 = arith.constant 0 : index
    %c0_17 = arith.constant 0 : index
    %40 = vector.load %arg3[%c0_16, %c0_17] : memref<24x32xf32, #tpu.memory_space<vmem>>, vector<24x32xf32>
    %41 = vector.extract_strided_slice %0 {offsets = [0, 0], sizes = [1, 32], strides = [1, 1]} : vector<6x32xf32> to vector<1x32xf32>
    %42 = vector.extract_strided_slice %0 {offsets = [1, 0], sizes = [1, 32], strides = [1, 1]} : vector<6x32xf32> to vector<1x32xf32>
    %43 = tpu.concatenate %39, %14, %15 in 1 : vector<16x8xf32>, vector<16x8xf32>, vector<16x8xf32> -> vector<16x24xf32>
    %cst_18 = arith.constant dense<0.000000e+00> : vector<16x32xf32>
    %44 = tpu.matmul %43, %40, %cst_18 {dimension_numbers = #tpu.dot_dimension_numbers<[1], [0], [0], [1], [0, 0, 1, 1], [], []>} : vector<16x24xf32>, vector<24x32xf32>, vector<16x32xf32> -> vector<16x32xf32>
    %cst_19 = arith.constant dense<0.000000e+00> : vector<32xf32>
    %45 = vector.multi_reduction <add>, %44, %cst_19 [0] : vector<16x32xf32> to vector<32xf32>
    %46 = vector.shape_cast %45 : vector<32xf32> to vector<1x32xf32>
    %cst_20 = arith.constant 1.600000e+01 : f32
    %47 = vector.broadcast %cst_20 : f32 to vector<1x32xf32>
    %48 = arith.divf %46, %47 : vector<1x32xf32>
    %49 = vector.broadcast %48 : vector<1x32xf32> to vector<16x32xf32>
    %50 = arith.subf %44, %49 : vector<16x32xf32>
    %51 = arith.mulf %50, %50 : vector<16x32xf32>
    %cst_21 = arith.constant dense<0.000000e+00> : vector<32xf32>
    %52 = vector.multi_reduction <add>, %51, %cst_21 [0] : vector<16x32xf32> to vector<32xf32>
    %53 = vector.shape_cast %52 : vector<32xf32> to vector<1x32xf32>
    %cst_22 = arith.constant 1.600000e+01 : f32
    %54 = vector.broadcast %cst_22 : f32 to vector<1x32xf32>
    %55 = arith.divf %53, %54 : vector<1x32xf32>
    %cst_23 = arith.constant 9.99999974E-6 : f32
    %56 = vector.broadcast %cst_23 : f32 to vector<1x32xf32>
    %57 = arith.addf %55, %56 : vector<1x32xf32>
    %58 = math.rsqrt %57 : vector<1x32xf32>
    %59 = arith.mulf %41, %58 : vector<1x32xf32>
    %60 = arith.mulf %48, %59 : vector<1x32xf32>
    %61 = arith.subf %42, %60 : vector<1x32xf32>
    %62 = vector.broadcast %59 : vector<1x32xf32> to vector<16x32xf32>
    %63 = arith.mulf %44, %62 : vector<16x32xf32>
    %64 = vector.broadcast %61 : vector<1x32xf32> to vector<16x32xf32>
    %65 = arith.addf %63, %64 : vector<16x32xf32>
    %cst_24 = arith.constant 0.000000e+00 : f32
    %66 = vector.broadcast %cst_24 : f32 to vector<16x32xf32>
    %67 = arith.maximumf %65, %66 : vector<16x32xf32>
    %c0_25 = arith.constant 0 : index
    %c0_26 = arith.constant 0 : index
    %68 = vector.load %arg8[%c0_25, %c0_26] : memref<16x32xf32, #tpu.memory_space<vmem>>, vector<16x32xf32>
    tpu.vector_store %arg8[%c0_25, %c0_26], %67 {strides = array<i32>} : memref<16x32xf32, #tpu.memory_space<vmem>>, vector<16x32xf32>,
    %c0_27 = arith.constant 0 : index
    %c0_28 = arith.constant 0 : index
    %69 = tpu.strided_load %arg8[%c0_27, %c0_28] {strides = array<i32: 2, 1>} : memref<16x32xf32, #tpu.memory_space<vmem>>, vector<8x32xf32>
    %c1 = arith.constant 1 : index
    %c0_29 = arith.constant 0 : index
    %70 = tpu.strided_load %arg8[%c1, %c0_29] {strides = array<i32: 2, 1>} : memref<16x32xf32, #tpu.memory_space<vmem>>, vector<8x32xf32>
    %71 = vector.extract_strided_slice %70 {offsets = [7, 0], sizes = [1, 32], strides = [1, 1]} : vector<8x32xf32> to vector<1x32xf32>
    %72 = vector.extract_strided_slice %70 {offsets = [0, 0], sizes = [7, 32], strides = [1, 1]} : vector<8x32xf32> to vector<7x32xf32>
    %73 = tpu.concatenate %71, %72 in 0 : vector<1x32xf32>, vector<7x32xf32> -> vector<8x32xf32>
    %74 = tpu.iota {dimensions = array<i32: 0>} : vector<8x32xi32>
    %c4_i32 = arith.constant 4 : i32
    %c0_i32_30 = arith.constant 0 : i32
    %75 = arith.cmpi eq, %c4_i32, %c0_i32_30 : i32
    %c1_i32_31 = arith.constant 1 : i32
    %76 = arith.select %75, %c1_i32_31, %c4_i32 : i32
    %77 = vector.broadcast %76 : i32 to vector<8x32xi32>
    %78 = arith.remsi %74, %77 : vector<8x32xi32>
    %c0_i32_32 = arith.constant 0 : i32
    %79 = vector.broadcast %c0_i32_32 : i32 to vector<8x32xi32>
    %80 = arith.cmpi ne, %78, %79 : vector<8x32xi32>
    %c0_i32_33 = arith.constant 0 : i32
    %81 = vector.broadcast %c0_i32_33 : i32 to vector<8x32xi32>
    %82 = arith.cmpi slt, %78, %81 : vector<8x32xi32>
    %c0_i32_34 = arith.constant 0 : i32
    %83 = arith.cmpi slt, %76, %c0_i32_34 : i32
    %84 = vector.broadcast %83 : i1 to vector<8x32xi1>
    %85 = vector.broadcast %84 : vector<8x32xi1> to vector<8x32xi1>
    %86 = arith.xori %82, %85 : vector<8x32xi1>
    %87 = arith.andi %86, %80 : vector<8x32xi1>
    %88 = vector.broadcast %76 : i32 to vector<8x32xi32>
    %89 = arith.addi %78, %88 : vector<8x32xi32>
    %90 = arith.select %87, %89, %78 : vector<8x32xi1>, vector<8x32xi32>
    %c0_i32_35 = arith.constant 0 : i32
    %91 = vector.broadcast %c0_i32_35 : i32 to vector<8x32xi32>
    %92 = arith.cmpi eq, %90, %91 : vector<8x32xi32>
    %cst_36 = arith.constant 0.000000e+00 : f32
    %93 = vector.broadcast %cst_36 : f32 to vector<8x32xf32>
    %94 = arith.select %92, %93, %73 : vector<8x32xi1>, vector<8x32xf32>
    %95 = vector.extract_strided_slice %1 {offsets = [0, 0, 0], sizes = [1, 96, 32], strides = [1, 1, 1]} : vector<2x96x32xf32> to vector<1x96x32xf32>
    %96 = vector.shape_cast %95 : vector<1x96x32xf32> to vector<96x32xf32>
    %97 = vector.extract_strided_slice %0 {offsets = [2, 0], sizes = [1, 32], strides = [1, 1]} : vector<6x32xf32> to vector<1x32xf32>
    %98 = vector.extract_strided_slice %0 {offsets = [3, 0], sizes = [1, 32], strides = [1, 1]} : vector<6x32xf32> to vector<1x32xf32>
    %99 = tpu.concatenate %94, %69, %70 in 1 : vector<8x32xf32>, vector<8x32xf32>, vector<8x32xf32> -> vector<8x96xf32>
    %cst_37 = arith.constant dense<0.000000e+00> : vector<8x32xf32>
    %100 = tpu.matmul %99, %96, %cst_37 {dimension_numbers = #tpu.dot_dimension_numbers<[1], [0], [0], [1], [0, 0, 1, 1], [], []>} : vector<8x96xf32>, vector<96x32xf32>, vector<8x32xf32> -> vector<8x32xf32>
    %cst_38 = arith.constant dense<0.000000e+00> : vector<32xf32>
    %101 = vector.multi_reduction <add>, %100, %cst_38 [0] : vector<8x32xf32> to vector<32xf32>
    %102 = vector.shape_cast %101 : vector<32xf32> to vector<1x32xf32>
    %cst_39 = arith.constant 8.000000e+00 : f32
    %103 = vector.broadcast %cst_39 : f32 to vector<1x32xf32>
    %104 = arith.divf %102, %103 : vector<1x32xf32>
    %105 = vector.broadcast %104 : vector<1x32xf32> to vector<8x32xf32>
    %106 = arith.subf %100, %105 : vector<8x32xf32>
    %107 = arith.mulf %106, %106 : vector<8x32xf32>
    %cst_40 = arith.constant dense<0.000000e+00> : vector<32xf32>
    %108 = vector.multi_reduction <add>, %107, %cst_40 [0] : vector<8x32xf32> to vector<32xf32>
    %109 = vector.shape_cast %108 : vector<32xf32> to vector<1x32xf32>
    %cst_41 = arith.constant 8.000000e+00 : f32
    %110 = vector.broadcast %cst_41 : f32 to vector<1x32xf32>
    %111 = arith.divf %109, %110 : vector<1x32xf32>
    %cst_42 = arith.constant 9.99999974E-6 : f32
    %112 = vector.broadcast %cst_42 : f32 to vector<1x32xf32>
    %113 = arith.addf %111, %112 : vector<1x32xf32>
    %114 = math.rsqrt %113 : vector<1x32xf32>
    %115 = arith.mulf %97, %114 : vector<1x32xf32>
    %116 = arith.mulf %104, %115 : vector<1x32xf32>
    %117 = arith.subf %98, %116 : vector<1x32xf32>
    %118 = vector.broadcast %115 : vector<1x32xf32> to vector<8x32xf32>
    %119 = arith.mulf %100, %118 : vector<8x32xf32>
    %120 = vector.broadcast %117 : vector<1x32xf32> to vector<8x32xf32>
    %121 = arith.addf %119, %120 : vector<8x32xf32>
    %cst_43 = arith.constant 0.000000e+00 : f32
    %122 = vector.broadcast %cst_43 : f32 to vector<8x32xf32>
    %123 = arith.maximumf %121, %122 : vector<8x32xf32>
    %c0_44 = arith.constant 0 : index
    %c0_45 = arith.constant 0 : index
    %124 = vector.load %arg9[%c0_44, %c0_45] : memref<8x32xf32, #tpu.memory_space<vmem>>, vector<8x32xf32>
    tpu.vector_store %arg9[%c0_44, %c0_45], %123 {strides = array<i32>} : memref<8x32xf32, #tpu.memory_space<vmem>>, vector<8x32xf32>,
    %c0_46 = arith.constant 0 : index
    %c0_47 = arith.constant 0 : index
    %125 = tpu.strided_load %arg9[%c0_46, %c0_47] {strides = array<i32: 2, 1>} : memref<8x32xf32, #tpu.memory_space<vmem>>, vector<4x32xf32>
    %c1_48 = arith.constant 1 : index
    %c0_49 = arith.constant 0 : index
    %126 = tpu.strided_load %arg9[%c1_48, %c0_49] {strides = array<i32: 2, 1>} : memref<8x32xf32, #tpu.memory_space<vmem>>, vector<4x32xf32>
    %127 = vector.extract_strided_slice %126 {offsets = [3, 0], sizes = [1, 32], strides = [1, 1]} : vector<4x32xf32> to vector<1x32xf32>
    %128 = vector.extract_strided_slice %126 {offsets = [0, 0], sizes = [3, 32], strides = [1, 1]} : vector<4x32xf32> to vector<3x32xf32>
    %129 = tpu.concatenate %127, %128 in 0 : vector<1x32xf32>, vector<3x32xf32> -> vector<4x32xf32>
    %130 = tpu.iota {dimensions = array<i32: 0>} : vector<4x32xi32>
    %c2_i32 = arith.constant 2 : i32
    %c0_i32_50 = arith.constant 0 : i32
    %131 = arith.cmpi eq, %c2_i32, %c0_i32_50 : i32
    %c1_i32_51 = arith.constant 1 : i32
    %132 = arith.select %131, %c1_i32_51, %c2_i32 : i32
    %133 = vector.broadcast %132 : i32 to vector<4x32xi32>
    %134 = arith.remsi %130, %133 : vector<4x32xi32>
    %c0_i32_52 = arith.constant 0 : i32
    %135 = vector.broadcast %c0_i32_52 : i32 to vector<4x32xi32>
    %136 = arith.cmpi ne, %134, %135 : vector<4x32xi32>
    %c0_i32_53 = arith.constant 0 : i32
    %137 = vector.broadcast %c0_i32_53 : i32 to vector<4x32xi32>
    %138 = arith.cmpi slt, %134, %137 : vector<4x32xi32>
    %c0_i32_54 = arith.constant 0 : i32
    %139 = arith.cmpi slt, %132, %c0_i32_54 : i32
    %140 = vector.broadcast %139 : i1 to vector<4x32xi1>
    %141 = vector.broadcast %140 : vector<4x32xi1> to vector<4x32xi1>
    %142 = arith.xori %138, %141 : vector<4x32xi1>
    %143 = arith.andi %142, %136 : vector<4x32xi1>
    %144 = vector.broadcast %132 : i32 to vector<4x32xi32>
    %145 = arith.addi %134, %144 : vector<4x32xi32>
    %146 = arith.select %143, %145, %134 : vector<4x32xi1>, vector<4x32xi32>
    %c0_i32_55 = arith.constant 0 : i32
    %147 = vector.broadcast %c0_i32_55 : i32 to vector<4x32xi32>
    %148 = arith.cmpi eq, %146, %147 : vector<4x32xi32>
    %cst_56 = arith.constant 0.000000e+00 : f32
    %149 = vector.broadcast %cst_56 : f32 to vector<4x32xf32>
    %150 = arith.select %148, %149, %129 : vector<4x32xi1>, vector<4x32xf32>
    %151 = vector.extract_strided_slice %1 {offsets = [1, 0, 0], sizes = [1, 96, 32], strides = [1, 1, 1]} : vector<2x96x32xf32> to vector<1x96x32xf32>
    %152 = vector.shape_cast %151 : vector<1x96x32xf32> to vector<96x32xf32>
    %153 = vector.extract_strided_slice %0 {offsets = [4, 0], sizes = [1, 32], strides = [1, 1]} : vector<6x32xf32> to vector<1x32xf32>
    %154 = vector.extract_strided_slice %0 {offsets = [5, 0], sizes = [1, 32], strides = [1, 1]} : vector<6x32xf32> to vector<1x32xf32>
    %155 = tpu.concatenate %150, %125, %126 in 1 : vector<4x32xf32>, vector<4x32xf32>, vector<4x32xf32> -> vector<4x96xf32>
    %cst_57 = arith.constant dense<0.000000e+00> : vector<4x32xf32>
    %156 = tpu.matmul %155, %152, %cst_57 {dimension_numbers = #tpu.dot_dimension_numbers<[1], [0], [0], [1], [0, 0, 1, 1], [], []>} : vector<4x96xf32>, vector<96x32xf32>, vector<4x32xf32> -> vector<4x32xf32>
    %cst_58 = arith.constant dense<0.000000e+00> : vector<32xf32>
    %157 = vector.multi_reduction <add>, %156, %cst_58 [0] : vector<4x32xf32> to vector<32xf32>
    %158 = vector.shape_cast %157 : vector<32xf32> to vector<1x32xf32>
    %cst_59 = arith.constant 4.000000e+00 : f32
    %159 = vector.broadcast %cst_59 : f32 to vector<1x32xf32>
    %160 = arith.divf %158, %159 : vector<1x32xf32>
    %161 = vector.broadcast %160 : vector<1x32xf32> to vector<4x32xf32>
    %162 = arith.subf %156, %161 : vector<4x32xf32>
    %163 = arith.mulf %162, %162 : vector<4x32xf32>
    %cst_60 = arith.constant dense<0.000000e+00> : vector<32xf32>
    %164 = vector.multi_reduction <add>, %163, %cst_60 [0] : vector<4x32xf32> to vector<32xf32>
    %165 = vector.shape_cast %164 : vector<32xf32> to vector<1x32xf32>
    %cst_61 = arith.constant 4.000000e+00 : f32
    %166 = vector.broadcast %cst_61 : f32 to vector<1x32xf32>
    %167 = arith.divf %165, %166 : vector<1x32xf32>
    %cst_62 = arith.constant 9.99999974E-6 : f32
    %168 = vector.broadcast %cst_62 : f32 to vector<1x32xf32>
    %169 = arith.addf %167, %168 : vector<1x32xf32>
    %170 = math.rsqrt %169 : vector<1x32xf32>
    %171 = arith.mulf %153, %170 : vector<1x32xf32>
    %172 = arith.mulf %160, %171 : vector<1x32xf32>
    %173 = arith.subf %154, %172 : vector<1x32xf32>
    %174 = vector.broadcast %171 : vector<1x32xf32> to vector<4x32xf32>
    %175 = arith.mulf %156, %174 : vector<4x32xf32>
    %176 = vector.broadcast %173 : vector<1x32xf32> to vector<4x32xf32>
    %177 = arith.addf %175, %176 : vector<4x32xf32>
    %cst_63 = arith.constant 0.000000e+00 : f32
    %178 = vector.broadcast %cst_63 : f32 to vector<4x32xf32>
    %179 = arith.maximumf %177, %178 : vector<4x32xf32>
    %c0_64 = arith.constant 0 : index
    %c0_65 = arith.constant 0 : index
    %180 = vector.load %arg9[%c0_64, %c0_65] : memref<8x32xf32, #tpu.memory_space<vmem>>, vector<4x32xf32>
    tpu.vector_store %arg9[%c0_64, %c0_65], %179 {strides = array<i32>} : memref<8x32xf32, #tpu.memory_space<vmem>>, vector<4x32xf32>,
    %c0_66 = arith.constant 0 : index
    %c0_67 = arith.constant 0 : index
    %181 = tpu.strided_load %arg9[%c0_66, %c0_67] {strides = array<i32: 2, 1>} : memref<8x32xf32, #tpu.memory_space<vmem>>, vector<2x32xf32>
    %c1_68 = arith.constant 1 : index
    %c0_69 = arith.constant 0 : index
    %182 = tpu.strided_load %arg9[%c1_68, %c0_69] {strides = array<i32: 2, 1>} : memref<8x32xf32, #tpu.memory_space<vmem>>, vector<2x32xf32>
    %183 = arith.maximumf %181, %182 : vector<2x32xf32>
    %c0_70 = arith.constant 0 : index
    %c0_71 = arith.constant 0 : index
    %184 = vector.load %arg6[%c0_70, %c0_71] : memref<33x128xf32, #tpu.memory_space<vmem>>, vector<33x128xf32>
    %185 = vector.extract_strided_slice %184 {offsets = [0, 0], sizes = [32, 128], strides = [1, 1]} : vector<33x128xf32> to vector<32x128xf32>
    %cst_72 = arith.constant dense<0.000000e+00> : vector<2x128xf32>
    %186 = tpu.matmul %183, %185, %cst_72 {dimension_numbers = #tpu.dot_dimension_numbers<[1], [0], [0], [1], [0, 0, 1, 1], [], []>} : vector<2x32xf32>, vector<32x128xf32>, vector<2x128xf32> -> vector<2x128xf32>
    %187 = vector.extract_strided_slice %184 {offsets = [32, 0], sizes = [1, 128], strides = [1, 1]} : vector<33x128xf32> to vector<1x128xf32>
    %188 = vector.broadcast %187 : vector<1x128xf32> to vector<2x128xf32>
    %189 = arith.addf %186, %188 : vector<2x128xf32>
    %c0_73 = arith.constant 0 : index
    %c0_74 = arith.constant 0 : index
    %190 = vector.load %arg7[%c0_73, %c0_74] : memref<2x128xf32, #tpu.memory_space<vmem>>, vector<2x128xf32>
    tpu.vector_store %arg7[%c0_73, %c0_74], %189 {strides = array<i32>} : memref<2x128xf32, #tpu.memory_space<vmem>>, vector<2x128xf32>,
    return
  }
}

</mosaic_0001>

<bundles_post_ra>
// kernel: tpu_custom_call.1
= control target key start
LH: loop header
LB: loop body
LE: loop exit
PB: predicated region body
PF: predicated region fallthrough
CT: control target
= control target key end

     0   :  { %vm92_vm0 = vcmask 1043456   ;;  %v623_v2 = vmov 0   ;;  %s840_s0 = inlined_call_operand.vmem [shape: s32[16,1], index: 0, kind: input, shape index: {}]   ;;  %s841_s1 = inlined_call_operand.vmem [shape: s32[16,1], index: 1, kind: input, shape index: {}]   ;;  %s842_s2 = inlined_call_operand.vmem [shape: f32[20,8], index: 2, kind: input, shape index: {}]   ;;  %s843_s3 = inlined_call_operand.vmem [shape: f32[24,32], index: 3, kind: input, shape index: {}]   ;;  %s844_s4 = inlined_call_operand.vmem [shape: f32[2,96,32], index: 4, kind: input, shape index: {}]   ;;  %s845_s5 = inlined_call_operand.vmem [shape: f32[6,32], index: 5, kind: input, shape index: {}]   ;;  %s846_s6 = inlined_call_operand.vmem [shape: f32[33,128], index: 6, kind: input, shape index: {}]   ;;  %s847_s7 = inlined_call_operand.hbm [shape: f32[2,128], index: 7, kind: output, shape index: {}]  }
   0x1   :  { %v58_v0 = vld [vmem:[%s840_s0 + $0x8] sm:$0xff]  ;;  %v57_v1 = vld [vmem:[%s840_s0] sm:$0xff]  ;;  %583 = vset.pattern.permute.xlu1 %v623_v2  ;;  %582 = vset.pattern.permute.xlu0 %v623_v2  ;;  %v56_v3 = vld [vmem:[%s842_s2 + $0x10] sm:$0xf] }
   0x2   :  { %63 = vperm.xlu1 %583, %v58_v0   ;;  %60 = vperm.xlu0 %582, %v57_v1  }
   0x3   :  { %12 = vsyncpa [#allocation5], 0  ;;  %561 = vmatpush.msk.msra.mxu0 %vm92_vm0, %v56_v3  ;;  %564 = vmatpush.msk.msra.mxu1 %vm92_vm0, %v56_v3  ;;  %v72_v4 = vld [vmem:[%s841_s1 + $0x8] sm:$0xff]  ;;  %v71_v5 = vld [vmem:[%s841_s1] sm:$0xff]  ;;  %v52_v8 = vlaneseq  ;;  %vm85_vm1 = vcmask 162816   ;;  %v624_v12 = vmov 0.0  }
   0x4   :  { %v55_v6 = vld [vmem:[%s842_s2 + $0x8] sm:$0xff]  ;;  %v54_v7 = vld [vmem:[%s842_s2] sm:$0xff]  ;;  %s625_s1 = smov 8   ;;  %s626_s2 = smov 16   ;;  %v191_v23 = vld [vmem:[%s843_s3 + $0x10] sm:$0xff]  ;;  %vm152_vm6 = vcmask 1040384  }
   0x5   :  { %110 = vmatpush.msra.mxu0 %v55_v6  ;;  %139 = vmatpush.msra.mxu1 %v55_v6  ;;  %v53_v9 = vand.u32 127, %v52_v8  ;;  %v190_v24 = vld [vmem:[%s843_s3 + $0x8] sm:$0xff]  ;;  %v189_v25 = vld [vmem:[%s843_s3] sm:$0xff]  ;;  %v707_v26 = vshrl.u32 %v52_v8, 7  ;;  %vm206_vm8 = vcmask 64512   ;;  %vm209_vm9 = vcmask 130048  }
   0x6   :  { %232 = vmatpush.msra.mxu2 %v191_v23  ;;  %vm212_vm10 = vcmask 195584   ;;  %v627_v44 = vmov 16.0   ;;  %vm242_vm12 = vcmask 261120   ;;  %s629_s21 = smov 32   ;;  %s632_s25 = smov [#allocation4]  }
   0x7   :  { %111 = vmatpush.msra.mxu0 %v54_v7  ;;  %140 = vmatpush.msra.mxu1 %v54_v7  ;;  %v165_v28 = vand.u32 7, %v707_v26  ;;  %v160_v36 = vadd.s32 8, %v707_v26  ;;  %585 = vrcp.f32 %v627_v44  ;;  %v32_v44 = vld [vmem:[%s844_s4 + $0x20] sm:$0xff]  ;;  %s546_s26 = sshll.u32 %s632_s25, 4  ;;  %s547_s26 = int_to_ptr.vmem [resolvable:$true] %s546_s26 }
   0x8   :  { %233 = vmatpush.msra.mxu2 %v190_v24 }
   0x9   :  { %vm185_vm7 = vcmp.eq.s32.totalorder %v165_v28, 0  ;;  %v172_v37 = vand.u32 7, %v160_v36 }
   0xa   :  { %77 = vperm.xlu1 %583, %v72_v4   ;;  %74 = vperm.xlu0 %582, %v71_v5  }
   0xb   :  { %234 = vmatpush.msra.mxu2 %v189_v25  ;;  %vm186_vm11 = vcmp.eq.s32.totalorder %v172_v37, 0  ;;  %v39_v37 = vld [vmem:[%s844_s4 + $0x58] sm:$0xff] }
   0xc   :  { %340 = vmatpush.msra.mxu3 %v39_v37 }
   0xd   :  { %v586_v46 = vpop.eup %585 }
   0xe   :  { %v253_v47 = vmul.f32 16.0, %v586_v46  ;;  %vm257_vm13 = vweird.f32 %v586_v46 }
  0x10   :  { %v254_v51 = vsub.f32 1.0, %v253_v47  ;;  %v29_v47 = vld [vmem:[%s844_s4 + $0x8] sm:$0xff] }
  0x12   :  { %v255_v54 = vmul.f32 %v586_v46, %v254_v51 }
  0x14   :  { %v256_v57 = vadd.f32 %v586_v46, %v255_v54 }
  0x16   :  { %v258_v60 = vsel %vm257_vm13, %v586_v46, %v256_v57  ;;  %v30_v46 = vld [vmem:[%s844_s4 + $0x10] sm:$0xff] }
  0x74   :  { %v61_v10 = vpop.permute.xlu0 %60  ;;  %v64_v11 = vpop.permute.xlu1 %63 }
  0x75   :  { %vm65_vm2 = vcmp.eq.s32.totalorder %v61_v10, %v53_v9  ;;  %vm66_vm3 = vcmp.eq.s32.totalorder %v64_v11, %v53_v9 }
  0x76   :  { %v557_v13 = vsel %vm65_vm2, 1.0, %v624_v12  ;;  %v558_v14 = vsel %vm66_vm3, 1.0, %v624_v12  ;;  %vm330_vm2 = vcmask 523264   ;;  %vm332_vm3 = vcmask 785408  }
  0x77   :  { %562 = vmatmul.msk.f32.vlgmr.msra.gmra.mxu0 %vm85_vm1, %v557_v13 }
  0x7c   :  { %v75_v15 = vpop.permute.xlu0 %74  ;;  %v78_v17 = vpop.permute.xlu1 %77 }
  0x7d   :  { %vm79_vm4 = vcmp.eq.s32.totalorder %v75_v15, %v53_v9  ;;  %vm80_vm5 = vcmp.eq.s32.totalorder %v78_v17, %v53_v9 }
  0x7e   :  { %v559_v16 = vsel %vm79_vm4, 1.0, %v624_v12  ;;  %v560_v18 = vsel %vm80_vm5, 1.0, %v624_v12 }
  0x7f   :  { %563 = vmatmul.msk.f32.gmra.mxu0 %vm85_vm1, %v558_v14  ;;  %565 = vmatmul.msk.f32.vlgmr.msra.gmra.mxu1 %vm85_vm1, %v559_v16 }
  0x87   :  { %566 = vmatmul.msk.f32.gmra.mxu1 %vm85_vm1, %v560_v18 }
  0xf4   :  { %v113_v19 = vpop.f32.mrf.mxu0 }
  0xf5   :  { %194 = vrot.lane.b32.xlu2 %v113_v19, %s625_s1  ;;  %v720_v19 = vld [vmem:[%s845_s5] sm:$0x3f]  ;;  %s628_s5 = smov 64  }
  0xfc   :  { %v116_v20 = vpop.f32.mrf.mxu0  ;;  %v142_v21 = vpop.f32.mrf.mxu1 }
  0xfd   :  { %200 = vrot.lane.b32.xlu2 %v142_v21, %s626_s2  ;;  %196 = vrot.lane.b32.xlu0 %v116_v20, %s625_s1  ;;  %v153_v30 = vrot.slane %v142_v21, 7 }
 0x104   :  { %v145_v22 = vpop.f32.mrf.mxu1 }
 0x105   :  { %202 = vrot.lane.b32.xlu1 %v145_v22, %s626_s2  ;;  %v149_v27 = vrot.slane %v145_v22, 7 }
 0x107   :  { %v157_v31 = vsel %vm152_vm6, %v149_v27, %v153_v30  ;;  %v154_v38 = vsel %vm152_vm6, %v153_v30, %v149_v27 }
 0x108   :  { %v187_v32 = vsel %vm185_vm7, 0.0, %v157_v31  ;;  %v188_v40 = vsel %vm186_vm11, 0.0, %v154_v38  ;;  %v38_v38 = vld [vmem:[%s844_s4 + $0x50] sm:$0xff] }
 0x109   :  { %341 = vmatpush.msra.mxu3 %v38_v38 }
 0x14f   :  { %v195_v29 = vpop.permute.xlu2 %194 }
 0x150   :  { %v207_v33 = vsel %vm206_vm8, %v187_v32, %v195_v29 }
 0x157   :  { %v201_v34 = vpop.permute.xlu2 %200 }
 0x158   :  { %v210_v35 = vsel %vm209_vm9, %v207_v33, %v201_v34 }
 0x159   :  { %567 = vmatmul.msk.f32.vlgmr.msra.gmra.mxu2 %vm212_vm10, %v210_v35 }
 0x16f   :  { %v197_v39 = vpop.permute.xlu0 %196 }
 0x170   :  { %v208_v41 = vsel %vm206_vm8, %v188_v40, %v197_v39  ;;  %v37_v39 = vld [vmem:[%s844_s4 + $0x48] sm:$0xff]  ;;  %v36_v40 = vld [vmem:[%s844_s4 + $0x40] sm:$0xff] }
 0x171   :  { %342 = vmatpush.msra.mxu3 %v37_v39  ;;  %v51_v39 = vld [vmem:[%s844_s4 + $0xb8] sm:$0xff] }
 0x172   :  { %443 = vmatpush.msrb.mxu0 %v51_v39 }
 0x173   :  { %343 = vmatpush.msra.mxu3 %v36_v40  ;;  %v50_v40 = vld [vmem:[%s844_s4 + $0xb0] sm:$0xff] }
 0x174   :  { %444 = vmatpush.msrb.mxu0 %v50_v40 }
 0x177   :  { %v203_v42 = vpop.permute.xlu1 %202 }
 0x178   :  { %v211_v43 = vsel %vm209_vm9, %v208_v41, %v203_v42  ;;  %v35_v41 = vld [vmem:[%s844_s4 + $0x38] sm:$0xff]  ;;  %v34_v42 = vld [vmem:[%s844_s4 + $0x30] sm:$0xff] }
 0x179   :  { %568 = vmatmul.msk.f32.gmra.mxu2 %vm212_vm10, %v211_v43  ;;  %344 = vmatpush.msra.mxu3 %v35_v41  ;;  %v33_v43 = vld [vmem:[%s844_s4 + $0x28] sm:$0xff]  ;;  %vm459_vm10 = vcmask 257024  }
 0x17a   :  { %v49_v41 = vld [vmem:[%s844_s4 + $0xa8] sm:$0xff] }
 0x17b   :  { %345 = vmatpush.msra.mxu3 %v34_v42  ;;  %v48_v42 = vld [vmem:[%s844_s4 + $0xa0] sm:$0xff]  ;;  %445 = vmatpush.msrb.mxu0 %v49_v41 }
 0x17d   :  { %346 = vmatpush.msra.mxu3 %v33_v43  ;;  %v47_v43 = vld [vmem:[%s844_s4 + $0x98] sm:$0xff]  ;;  %446 = vmatpush.msrb.mxu0 %v48_v42 }
 0x17f   :  { %347 = vmatpush.msra.mxu3 %v32_v44  ;;  %v46_v44 = vld [vmem:[%s844_s4 + $0x90] sm:$0xff]  ;;  %447 = vmatpush.msrb.mxu0 %v47_v43 }
 0x181   :  { %448 = vmatpush.msrb.mxu0 %v46_v44 }
 0x1dc   :  { %v236_v45 = vpop.f32.mrf.mxu2 }
 0x1dd   :  { %v243_v49 = vsel %vm242_vm12, %v236_v45, 0.0 }
 0x1fc   :  { %v239_v48 = vpop.f32.mrf.mxu2 }
 0x1fd   :  { %v244_v50 = vsel %vm242_vm12, %v239_v48, 0.0 }
 0x1fe   :  { %v245_v52 = vadd.f32 %v244_v50, %v243_v49  ;;  %v312_v49 = vand.u32 3, %v707_v26 }
 0x200   :  { %v246_v53 = vrot.slane %v245_v52, 4  ;;  %vm320_vm1 = vcmp.eq.s32.totalorder %v312_v49, 0  ;;  %v41_v49 = vld [vmem:[%s844_s4 + $0x68] sm:$0xff] }
 0x202   :  { %v247_v55 = vadd.f32 %v246_v53, %v245_v52 }
 0x204   :  { %v248_v56 = vrot.slane %v247_v55, 2 }
 0x206   :  { %v249_v58 = vadd.f32 %v248_v56, %v247_v55  ;;  %v630_v56 = vmov 8.0  }
 0x208   :  { %v250_v59 = vrot.slane %v249_v58, 1 }
 0x20a   :  { %v251_v61 = vadd.f32 %v250_v59, %v249_v58 }
 0x20c   :  { %v259_v62 = vmul.f32 %v258_v60, %v251_v61 }
 0x20e   :  { %v260_v63 = vsub.f32 %v236_v45, %v259_v62  ;;  %v261_v0 = vsub.f32 %v239_v48, %v259_v62 }
 0x210   :  { %v262_v1 = vmul.f32 %v260_v63, %v260_v63  ;;  %v263_v2 = vmul.f32 %v261_v0, %v261_v0 }
 0x212   :  { %v264_v3 = vsel %vm242_vm12, %v262_v1, 0.0  ;;  %v265_v4 = vsel %vm242_vm12, %v263_v2, 0.0 }
 0x213   :  { %v266_v5 = vadd.f32 %v265_v4, %v264_v3 }
 0x215   :  { %v267_v6 = vrot.slane %v266_v5, 4 }
 0x217   :  { %v268_v7 = vadd.f32 %v267_v6, %v266_v5 }
 0x219   :  { %v269_v8 = vrot.slane %v268_v7, 2 }
 0x21b   :  { %v270_v9 = vadd.f32 %v269_v8, %v268_v7 }
 0x21d   :  { %v271_v10 = vrot.slane %v270_v9, 1 }
 0x21f   :  { %v272_v11 = vadd.f32 %v271_v10, %v270_v9 }
 0x221   :  { %v273_v12 = vmul.f32 %v272_v11, %v258_v60 }
 0x223   :  { %v274_v13 = vadd.f32 1e-05, %v273_v12 }
 0x225   :  { %587 = vrsqrt.f32 %v274_v13  ;;  %vm281_vm15 = vweird.f32 %v274_v13 }
 0x226   :  { %589 = vrcp.f32 %v630_v56 }
 0x22b   :  { %v588_v14 = vpop.eup %587 }
 0x22c   :  { %v276_v15 = vmul.f32 %v588_v14, %v274_v13  ;;  %vm282_vm14 = vweird.f32 %v588_v14  ;;  %v590_v57 = vpop.eup %589 }
 0x22d   :  { %vm283_vm0 = vmor %vm281_vm15, %vm282_vm14  ;;  %v364_v58 = vmul.f32 8.0, %v590_v57  ;;  %vm368_vm4 = vweird.f32 %v590_v57 }
 0x22e   :  { %v277_v16 = vmul.f32 %v588_v14, %v276_v15 }
 0x22f   :  { %v365_v59 = vsub.f32 1.0, %v364_v58 }
 0x230   :  { %v278_v17 = vmul.f32 0.5, %v277_v16 }
 0x231   :  { %v366_v63 = vmul.f32 %v590_v57, %v365_v59 }
 0x232   :  { %v279_v18 = vsub.f32 1.5, %v278_v17 }
 0x233   :  { %v367_v2 = vadd.f32 %v590_v57, %v366_v63 }
 0x234   :  { %v280_v20 = vmul.f32 %v588_v14, %v279_v18 }
 0x235   :  { %v369_v5 = vsel %vm368_vm4, %v590_v57, %v367_v2 }
 0x236   :  { %v284_v21 = vsel %vm283_vm0, %v588_v14, %v280_v20 }
 0x237   :  { %v285_v22 = vmul.f32 %v284_v21, %v720_v19 }
 0x239   :  { %v286_v23 = vmul.f32 %v285_v22, %v259_v62  ;;  %v291_v25 = vperm.slane %v285_v22, 0 }
 0x23b   :  { %v288_v24 = vrot.slane %v286_v23, 7  ;;  %v292_v28 = vmul.f32 %v291_v25, %v236_v45  ;;  %v293_v29 = vmul.f32 %v291_v25, %v239_v48  ;;  %v31_v45 = vld [vmem:[%s844_s4 + $0x18] sm:$0xff]  ;;  %v28_v48 = vld [vmem:[%s844_s4] sm:$0xff] }
 0x23c   :  { %348 = vmatpush.msra.mxu3 %v31_v45  ;;  %v45_v45 = vld [vmem:[%s844_s4 + $0x88] sm:$0xff] }
 0x23d   :  { %v290_v27 = vsub.f32 %v720_v19, %v288_v24  ;;  %449 = vmatpush.msrb.mxu0 %v45_v45 }
 0x23e   :  { %349 = vmatpush.msra.mxu3 %v30_v46  ;;  %v44_v46 = vld [vmem:[%s844_s4 + $0x80] sm:$0xff] }
 0x23f   :  { %v294_v30 = vperm.slane %v290_v27, 1  ;;  %450 = vmatpush.msrb.mxu0 %v44_v46 }
 0x240   :  { %350 = vmatpush.msra.mxu3 %v29_v47  ;;  %v43_v47 = vld [vmem:[%s844_s4 + $0x78] sm:$0xff] }
 0x241   :  { %v295_v31 = vadd.f32 %v294_v30, %v292_v28  ;;  %v296_v32 = vadd.f32 %v294_v30, %v293_v29  ;;  %451 = vmatpush.msrb.mxu0 %v43_v47  ;;  %v584_v47 = vld [vmem:[%s846_s6 + $0x20] ss:$0 sm:$0xff] }
 0x242   :  { %351 = vmatpush.msra.mxu3 %v28_v48  ;;  %v42_v48 = vld [vmem:[%s844_s4 + $0x70] sm:$0xff] }
 0x243   :  { %v297_v33 = vmax.f32 %v295_v31, 0.0  ;;  %v298_v34 = vmax.f32 %v296_v32, 0.0  ;;  %452 = vmatpush.msrb.mxu0 %v42_v48 }
 0x245   :  { %299 = vst.msk [vmem:[#allocation2] sm:$0xff] %vm242_vm12, %v297_v33  ;;  %453 = vmatpush.msrb.mxu0 %v41_v49 }
 0x246   :  { %300 = vst.msk [vmem:[#allocation2 + $0x8] sm:$0xff] %vm242_vm12, %v298_v34 }
 0x24d   :  { %v303_v35 = vld [vmem:[#allocation2 + $0x1] ss:$2 sm:$0xff]  ;;  %v301_v36 = vld [vmem:[#allocation2] ss:$2 sm:$0xff] }
 0x24e   :  { %326 = vrot.lane.b32.xlu0 %v303_v35, %s628_s5  ;;  %323 = vrot.lane.b32.xlu2 %v301_v36, %s629_s21  ;;  %v305_v50 = vrot.slane %v303_v35, 7 }
 0x250   :  { %v321_v52 = vsel %vm320_vm1, 0.0, %v305_v50  ;;  %v40_v50 = vld [vmem:[%s844_s4 + $0x60] sm:$0xff] }
 0x251   :  { %454 = vmatpush.msrb.mxu0 %v40_v50 }
 0x2a8   :  { %v324_v51 = vpop.permute.xlu2 %323 }
 0x2a9   :  { %v329_v53 = vsel %vm242_vm12, %v321_v52, %v324_v51 }
 0x2c0   :  { %v327_v54 = vpop.permute.xlu0 %326 }
 0x2c1   :  { %v331_v55 = vsel %vm330_vm2, %v329_v53, %v327_v54  ;;  %v417_v53 = vand.u32 1, %v707_v26 }
 0x2c2   :  { %569 = vmatmul.msk.f32.vlgmr.msra.gmra.mxu3 %vm332_vm3, %v331_v55 }
 0x2c3   :  { %vm425_vm9 = vcmp.eq.s32.totalorder %v417_v53, 0 }
 0x345   :  { %v353_v60 = vpop.f32.mrf.mxu3 }
 0x346   :  { %v356_v61 = vsel %vm242_vm12, %v353_v60, 0.0 }
 0x347   :  { %v357_v62 = vrot.slane %v356_v61, 4 }
 0x349   :  { %v358_v0 = vadd.f32 %v357_v62, %v356_v61 }
 0x34b   :  { %v359_v1 = vrot.slane %v358_v0, 2 }
 0x34d   :  { %v360_v3 = vadd.f32 %v359_v1, %v358_v0 }
 0x34f   :  { %v361_v4 = vrot.slane %v360_v3, 1 }
 0x351   :  { %v362_v6 = vadd.f32 %v361_v4, %v360_v3 }
 0x353   :  { %v370_v7 = vmul.f32 %v369_v5, %v362_v6 }
 0x355   :  { %v371_v8 = vsub.f32 %v353_v60, %v370_v7 }
 0x357   :  { %v372_v9 = vmul.f32 %v371_v8, %v371_v8 }
 0x359   :  { %v373_v10 = vsel %vm242_vm12, %v372_v9, 0.0 }
 0x35a   :  { %v374_v11 = vrot.slane %v373_v10, 4 }
 0x35c   :  { %v375_v12 = vadd.f32 %v374_v11, %v373_v10 }
 0x35e   :  { %v376_v13 = vrot.slane %v375_v12, 2 }
 0x360   :  { %v377_v14 = vadd.f32 %v376_v13, %v375_v12 }
 0x362   :  { %v378_v15 = vrot.slane %v377_v14, 1 }
 0x364   :  { %v379_v16 = vadd.f32 %v378_v15, %v377_v14 }
 0x366   :  { %v380_v17 = vmul.f32 %v379_v16, %v369_v5 }
 0x368   :  { %v381_v18 = vadd.f32 1e-05, %v380_v17 }
 0x36a   :  { %591 = vrsqrt.f32 %v381_v18  ;;  %vm388_vm7 = vweird.f32 %v381_v18 }
 0x370   :  { %v592_v20 = vpop.eup %591 }
 0x371   :  { %v383_v21 = vmul.f32 %v592_v20, %v381_v18  ;;  %vm389_vm5 = vweird.f32 %v592_v20 }
 0x372   :  { %vm390_vm8 = vmor %vm388_vm7, %vm389_vm5 }
 0x373   :  { %v384_v22 = vmul.f32 %v592_v20, %v383_v21 }
 0x375   :  { %v385_v23 = vmul.f32 0.5, %v384_v22 }
 0x377   :  { %v386_v24 = vsub.f32 1.5, %v385_v23  ;;  %v514_v23 = vld [vmem:[%s846_s6 + $0x18] sm:$0xff] }
 0x378   :  { %532 = vmatpush.msrb.mxu1 %v514_v23 }
 0x379   :  { %v387_v25 = vmul.f32 %v592_v20, %v386_v24  ;;  %v513_v24 = vld [vmem:[%s846_s6 + $0x10] sm:$0xff] }
 0x37a   :  { %533 = vmatpush.msrb.mxu1 %v513_v24 }
 0x37b   :  { %v391_v27 = vsel %vm390_vm8, %v592_v20, %v387_v25  ;;  %v512_v25 = vld [vmem:[%s846_s6 + $0x8] sm:$0xff] }
 0x37c   :  { %v392_v28 = vmul.f32 %v391_v27, %v720_v19  ;;  %v511_v27 = vld [vmem:[%s846_s6] sm:$0xff]  ;;  %534 = vmatpush.msrb.mxu1 %v512_v25 }
 0x37e   :  { %v393_v29 = vmul.f32 %v392_v28, %v370_v7  ;;  %v398_v31 = vperm.slane %v392_v28, 2  ;;  %535 = vmatpush.msrb.mxu1 %v511_v27 }
 0x380   :  { %v395_v30 = vrot.slane %v393_v29, 7  ;;  %v399_v33 = vmul.f32 %v398_v31, %v353_v60  ;;  %v631_v60 = vmov 4.0  }
 0x381   :  { %593 = vrcp.f32 %v631_v60 }
 0x382   :  { %v397_v32 = vsub.f32 %v720_v19, %v395_v30 }
 0x384   :  { %v400_v34 = vperm.slane %v397_v32, 3 }
 0x386   :  { %v401_v35 = vadd.f32 %v400_v34, %v399_v33 }
 0x387   :  { %v594_v61 = vpop.eup %593 }
 0x388   :  { %v402_v36 = vmax.f32 %v401_v35, 0.0  ;;  %v468_v62 = vmul.f32 4.0, %v594_v61 }
 0x38a   :  { %403 = vst.msk [vmem:[#allocation3] sm:$0xff] %vm242_vm12, %v402_v36  ;;  %v469_v63 = vsub.f32 1.0, %v468_v62 }
 0x38c   :  { %v470_v2 = vmul.f32 %v594_v61, %v469_v63 }
 0x38e   :  { %v471_v5 = vadd.f32 %v594_v61, %v470_v2 }
 0x391   :  { %v406_v37 = vld [vmem:[#allocation3 + $0x1] ss:$2 sm:$0xf]  ;;  %v404_v38 = vld [vmem:[#allocation3] ss:$2 sm:$0xf] }
 0x392   :  { %431 = vrot.lane.b32.xlu2 %v406_v37, %s628_s5  ;;  %428 = vrot.lane.b32.xlu1 %v404_v38, %s629_s21  ;;  %v408_v51 = vrot.slane %v406_v37, 3  ;;  %v410_v52 = vrot.slane %v406_v37, 7  ;;  %s548_s21 = sshll.u32 %s847_s7, 4  ;;  %s549_s21 = int_to_ptr.hbm [resolvable:$true] %s548_s21 }
 0x394   :  { %v412_v54 = vsel %vm152_vm6, %v408_v51, %v410_v52  ;;  %vm472_vm6 = vweird.f32 %v594_v61 }
 0x395   :  { %v426_v55 = vsel %vm425_vm9, 0.0, %v412_v54  ;;  %v473_v8 = vsel %vm472_vm6, %v594_v61, %v471_v5 }
 0x3ec   :  { %v432_v57 = vpop.permute.xlu2 %431 }
 0x404   :  { %v429_v56 = vpop.permute.xlu1 %428 }
 0x405   :  { %v434_v58 = vsel %vm242_vm12, %v426_v55, %v429_v56 }
 0x406   :  { %v435_v59 = vsel %vm330_vm2, %v434_v58, %v432_v57 }
 0x407   :  { %570 = vmatmul.msk.f32.vlgmr.msrb.gmra.mxu0 %vm332_vm3, %v435_v59 }
 0x484   :  { %v456_v0 = vpop.f32.mrf.mxu0 }
 0x485   :  { %v460_v26 = vsel %vm459_vm10, %v456_v0, 0.0 }
 0x486   :  { %v461_v1 = vrot.slane %v460_v26, 4 }
 0x488   :  { %v462_v3 = vadd.f32 %v461_v1, %v460_v26 }
 0x48a   :  { %v463_v4 = vrot.slane %v462_v3, 2 }
 0x48c   :  { %v464_v6 = vadd.f32 %v463_v4, %v462_v3 }
 0x48e   :  { %v465_v7 = vrot.slane %v464_v6, 1 }
 0x490   :  { %v466_v9 = vadd.f32 %v465_v7, %v464_v6 }
 0x492   :  { %v474_v10 = vmul.f32 %v473_v8, %v466_v9 }
 0x494   :  { %v475_v11 = vsub.f32 %v456_v0, %v474_v10 }
 0x496   :  { %v476_v12 = vmul.f32 %v475_v11, %v475_v11 }
 0x498   :  { %v477_v13 = vsel %vm459_vm10, %v476_v12, 0.0 }
 0x499   :  { %v478_v14 = vrot.slane %v477_v13, 4 }
 0x49b   :  { %v479_v15 = vadd.f32 %v478_v14, %v477_v13 }
 0x49d   :  { %v480_v16 = vrot.slane %v479_v15, 2 }
 0x49f   :  { %v481_v17 = vadd.f32 %v480_v16, %v479_v15 }
 0x4a1   :  { %v482_v18 = vrot.slane %v481_v17, 1 }
 0x4a3   :  { %v483_v20 = vadd.f32 %v482_v18, %v481_v17 }
 0x4a5   :  { %v484_v21 = vmul.f32 %v483_v20, %v473_v8 }
 0x4a7   :  { %v485_v22 = vadd.f32 1e-05, %v484_v21 }
 0x4a9   :  { %595 = vrsqrt.f32 %v485_v22  ;;  %vm492_vm13 = vweird.f32 %v485_v22 }
 0x4af   :  { %v596_v28 = vpop.eup %595 }
 0x4b0   :  { %v487_v29 = vmul.f32 %v596_v28, %v485_v22  ;;  %vm493_vm11 = vweird.f32 %v596_v28 }
 0x4b1   :  { %vm494_vm14 = vmor %vm492_vm13, %vm493_vm11 }
 0x4b2   :  { %v488_v30 = vmul.f32 %v596_v28, %v487_v29 }
 0x4b4   :  { %v489_v31 = vmul.f32 0.5, %v488_v30 }
 0x4b6   :  { %v490_v32 = vsub.f32 1.5, %v489_v31 }
 0x4b8   :  { %v491_v33 = vmul.f32 %v596_v28, %v490_v32 }
 0x4ba   :  { %v495_v34 = vsel %vm494_vm14, %v596_v28, %v491_v33 }
 0x4bb   :  { %v496_v35 = vmul.f32 %v495_v34, %v720_v19 }
 0x4bd   :  { %v497_v36 = vmul.f32 %v496_v35, %v474_v10  ;;  %v502_v38 = vperm.slane %v496_v35, 4 }
 0x4bf   :  { %v499_v37 = vrot.slane %v497_v36, 7  ;;  %v503_v40 = vmul.f32 %v502_v38, %v456_v0 }
 0x4c1   :  { %v501_v39 = vsub.f32 %v720_v19, %v499_v37 }
 0x4c3   :  { %v504_v41 = vperm.slane %v501_v39, 5 }
 0x4c5   :  { %v505_v42 = vadd.f32 %v504_v41, %v503_v40 }
 0x4c7   :  { %v506_v43 = vmax.f32 %v505_v42, 0.0 }
 0x4c9   :  { %507 = vst.msk [vmem:[#allocation3] sm:$0xf] %vm459_vm10, %v506_v43 }
 0x4d0   :  { %v508_v44 = vld [vmem:[#allocation3] ss:$2 sm:$0x3]  ;;  %v509_v45 = vld [vmem:[#allocation3 + $0x1] ss:$2 sm:$0x3] }
 0x4d1   :  { %v510_v46 = vmax.f32 %v508_v44, %v509_v45 }
 0x4d3   :  { %571 = vmatmul.msk.f32.vlgmr.msrb.gmra.mxu1 %vm242_vm12, %v510_v46 }
 0x550   :  { %v537_v19 = vpop.f32.mrf.mxu1 }
 0x551   :  { %v538_v48 = vadd.f32 %v584_v47, %v537_v19 }
 0x553   :  { %540 = vst [vmem:[#allocation4] sm:$0x3] %v538_v48 }
 0x554   :  { %551 = dma.vmem_to_hbm [thread:$0]  %s547_s26, 32, %s549_s21, [#allocation5]  }
 0x555   :  { %621 = dma.done.wait [#allocation5], 32  }
 0x556   :  { %622 = vsyncadd [#allocation5], 4294967264 }
 0x557   :  { %556 = vsyncpa [#allocation5], 1 }

</bundles_post_ra>
